<compile_context>
chip_gen: v7x
topology: tpu7x:2x2x1
jax: 0.10.0
libtpu: 0.0.40
codegen_flags: <defaults>
</compile_context>

<pallas_src>
import jax
import jax.numpy as jnp
from jax.experimental import pallas as pl
from jax.experimental.pallas import tpu as pltpu

LANE = 128
MAX_TILE_B = 4096          # fits v7x's 64 MiB VMEM with the layout below


def _cdiv(a, b):
    return -(-a // b)


def _round_up(x, m):
    return _cdiv(x, m) * m


# ----------------------------------------------------------------------------
# Kernel
# ----------------------------------------------------------------------------
def _fusion_kernel(t_ref, a_ref, v_ref,
                   w1t_ref, w1a_ref, w1v_ref, b1_ref,
                   w2_ref, b2_ref, w3_ref, b3_ref,
                   out_ref):
    """Fused 3-layer MLP on one batch tile.

    t/a/v_ref : [TB, S]        modality inputs (split-K of the concat)
    w1*_ref   : [S, Dp]        per-modality slices of W1 (lane-padded)
    b1/b2_ref : [1, Dp]
    w2_ref    : [Dp, Dp]
    w3_ref    : [1, Dp]        final projection as a row
    b3_ref    : [1]  (SMEM)    scalar bias
    out_ref   : [TB, 1]        output_fusion (loss is computed in the wrapper)
    """
    # TODO(synk): nn.Dropout treated as identity (eval-mode semantics).

    # Layer 1: split-K over the three pre-sliced weight blocks (no HBM concat).
    h1 = jnp.dot(t_ref[...], w1t_ref[...], preferred_element_type=jnp.float32)
    h1 = h1 + jnp.dot(a_ref[...], w1a_ref[...],
                      preferred_element_type=jnp.float32)
    h1 = h1 + jnp.dot(v_ref[...], w1v_ref[...],
                      preferred_element_type=jnp.float32)
    h1 = jnp.maximum(h1 + b1_ref[...], 0.0)

    # Layer 2 + ReLU (full 128-lane matmul on the padded hidden dim).
    h2 = jnp.dot(h1, w2_ref[...], preferred_element_type=jnp.float32)
    h2 = jnp.maximum(h2 + b2_ref[...], 0.0)

    # Layer 3: [Dp,1] projection done as VPU multiply + cross-lane reduce
    # (avoids an N=1 MXU matmul). Padded lanes of w3 are zero.
    out = jnp.sum(h2 * w3_ref[...], axis=-1, keepdims=True) + b3_ref[0]

    out_ref[...] = out.astype(out_ref.dtype)


# ----------------------------------------------------------------------------
# Parameter packing
# ----------------------------------------------------------------------------
def pack_params(params, swap_dim):
    """One-time prep: split W1 per modality and pad hidden dim to 128 lanes."""
    w1, b1 = params["w1"], params["b1"]          # [3S, D], [1, D]
    w2, b2 = params["w2"], params["b2"]          # [D, D],  [1, D]
    w3, b3 = params["w3"], params["b3"]          # [D, 1],  [1, 1]
    d = w2.shape[0]
    dp = _round_up(d, LANE)
    pad_d = dp - d

    def pad_cols(x):
        return jnp.pad(x, ((0, 0), (0, pad_d)))

    s = swap_dim
    return {
        "w1t": pad_cols(w1[0 * s:1 * s, :]),
        "w1a": pad_cols(w1[1 * s:2 * s, :]),
        "w1v": pad_cols(w1[2 * s:3 * s, :]),
        "b1": pad_cols(b1),
        "w2": jnp.pad(w2, ((0, pad_d), (0, pad_d))),
        "b2": pad_cols(b2),
        "w3": pad_cols(w3.T),                     # [1, Dp]
        "b3": b3.reshape((1,)),                   # scalar -> SMEM
    }


# ----------------------------------------------------------------------------
# Tile / VMEM sizing
# ----------------------------------------------------------------------------
def _select_tile(B, tile_b):
    """Pick a batch tile: balanced (no near-empty tail tile), capped for v7x
    VMEM, and producing >=2 grid steps whenever possible so the 'parallel'
    grid axis can be sharded across v7x's two TensorCores."""
    tile_b = min(tile_b, MAX_TILE_B)
    n_tiles = max(1, _cdiv(B, tile_b))
    tb = _round_up(_cdiv(B, n_tiles), 8)
    if B >= 16 and _cdiv(B, tb) < 2:
        tb = _round_up(_cdiv(B, 2), 8)
    return max(tb, 8)


def _vmem_budget_bytes(tb, S, Dp):
    """Double-buffered, lane-padded working set + headroom for the compiler."""
    in_block = tb * _round_up(S, LANE) * 4        # (tb, S) lane-padded to 128
    out_block = tb * LANE * 4                     # (tb, 1) lane-padded to 128
    io = (3 * in_block + out_block) * 2           # double-buffered streams
    weights = (3 * S * Dp + Dp * Dp + 3 * Dp) * 4   # single-buffered residents
    scratch = 2 * tb * Dp * 4                     # live h1 / h2 values
    budget = io + weights + scratch + (8 << 20)   # headroom
    return max(budget, 32 << 20)                  # never below the safe floor


# ----------------------------------------------------------------------------
# Wrapper
# ----------------------------------------------------------------------------
def fusion_model_forward(text, audio, video, labels, packed, *, tile_b=MAX_TILE_B):
    """Batch-tiled Pallas call; weights stay VMEM-resident (single-buffered)."""
    B, S = text.shape
    Dp = packed["w2"].shape[0]

    tb = _select_tile(B, tile_b)
    b_pad = _round_up(B, tb)
    if b_pad != B:
        pad = ((0, b_pad - B), (0, 0))
        text = jnp.pad(text, pad)
        audio = jnp.pad(audio, pad)
        video = jnp.pad(video, pad)

    row_spec = pl.BlockSpec((tb, S), lambda i: (i, 0))

    def resident(shape):
        # Constant index_map -> block never changes; one buffer is enough.
        return pl.BlockSpec(shape, lambda i: (0, 0),
                            pipeline_mode=pl.Buffered(1))

    out_padded = pl.pallas_call(
        _fusion_kernel,
        grid=(b_pad // tb,),
        in_specs=[
            row_spec, row_spec, row_spec,
            resident((S, Dp)), resident((S, Dp)), resident((S, Dp)),
            resident((1, Dp)),
            resident((Dp, Dp)), resident((1, Dp)),
            resident((1, Dp)),
            pl.BlockSpec(memory_space=pltpu.MemorySpace.SMEM),   # b3 scalar
        ],
        out_specs=pl.BlockSpec((tb, 1), lambda i: (i, 0)),
        out_shape=jax.ShapeDtypeStruct((b_pad, 1), jnp.float32),
        compiler_params=pltpu.CompilerParams(
            dimension_semantics=("parallel",),
            vmem_limit_bytes=_vmem_budget_bytes(tb, S, Dp)),
    )(text, audio, video,
      packed["w1t"], packed["w1a"], packed["w1v"], packed["b1"],
      packed["w2"], packed["b2"], packed["w3"], packed["b3"])

    out = out_padded[:B]
    # L1Loss(reduction='none'): trivial element-wise op, fused by XLA.
    loss = jnp.abs(out - labels)
    return loss, out


# ----------------------------------------------------------------------------
# Reference + init
# ----------------------------------------------------------------------------
def init_params(key, swap_dim, post_fusion_dim):
    """Deterministic synthetic parameter init (shapes match nn.Linear layers)."""
    k1, k2, k3, k4, k5, k6 = jax.random.split(key, 6)
    in1 = 3 * swap_dim
    scale1 = 1.0 / jnp.sqrt(in1)
    scale2 = 1.0 / jnp.sqrt(post_fusion_dim)
    return {
        # stored as [in, out] = PyTorch weight.T
        "w1": jax.random.uniform(k1, (in1, post_fusion_dim), jnp.float32,
                                 -scale1, scale1),
        "b1": jax.random.uniform(k2, (1, post_fusion_dim), jnp.float32,
                                 -scale1, scale1),
        "w2": jax.random.uniform(k3, (post_fusion_dim, post_fusion_dim),
                                 jnp.float32, -scale2, scale2),
        "b2": jax.random.uniform(k4, (1, post_fusion_dim), jnp.float32,
                                 -scale2, scale2),
        "w3": jax.random.uniform(k5, (post_fusion_dim, 1), jnp.float32,
                                 -scale2, scale2),
        "b3": jax.random.uniform(k6, (1, 1), jnp.float32, -scale2, scale2),
    }


def reference_forward(text, audio, video, labels, params):
    x = jnp.concatenate([text, audio, video], axis=-1)
    h1 = jnp.maximum(x @ params["w1"] + params["b1"], 0.0)
    h2 = jnp.maximum(h1 @ params["w2"] + params["b2"], 0.0)
    out = h2 @ params["w3"] + params["b3"]
    loss = jnp.abs(out - labels)
    return loss, out


if __name__ == "__main__":
    # Shapes implied by the module: text/audio/video [B, swap_dim], labels
    # [B, 1]; args.swap_dim = 32, args.post_fusion_dim = 32.
    SWAP_DIM, POST_DIM = 32, 32

    key = jax.random.PRNGKey(0)
    kp, kd = jax.random.split(key, 2)
    params = init_params(kp, SWAP_DIM, POST_DIM)
    packed = pack_params(params, SWAP_DIM)

    def make_inputs(k, b):
        kt, ka, kv, kl = jax.random.split(k, 4)
        return (jax.random.normal(kt, (b, SWAP_DIM), jnp.float32),
                jax.random.normal(ka, (b, SWAP_DIM), jnp.float32),
                jax.random.normal(kv, (b, SWAP_DIM), jnp.float32),
                jax.random.normal(kl, (b, 1), jnp.float32))

    # 1) Small batch (single grid step).
    B = 8
    text, audio, video, labels = make_inputs(kd, B)
    loss, out = fusion_model_forward(text, audio, video, labels, packed)
    jax.block_until_ready((loss, out))
    ref_loss, ref_out = reference_forward(text, audio, video, labels, params)
    assert out.shape == (B, 1) and loss.shape == (B, 1)
    assert jnp.allclose(out, ref_out, atol=1e-5, rtol=1e-5), "output mismatch"
    assert jnp.allclose(loss, ref_loss, atol=1e-5, rtol=1e-5), "loss mismatch"

    # 2) Multi-tile batch with an uneven tail (exercises balanced tiling,
    #    batch padding and the >=2-step parallel grid path).
    B2 = 300
    text2, audio2, video2, labels2 = make_inputs(jax.random.PRNGKey(1), B2)
    loss2, out2 = fusion_model_forward(text2, audio2, video2, labels2, packed,
                                       tile_b=128)
    jax.block_until_ready((loss2, out2))
    ref_loss2, ref_out2 = reference_forward(text2, audio2, video2, labels2,
                                            params)
    assert out2.shape == (B2, 1) and loss2.shape == (B2, 1)
    assert jnp.allclose(out2, ref_out2, atol=1e-5, rtol=1e-5), "output mismatch (tiled)"
    assert jnp.allclose(loss2, ref_loss2, atol=1e-5, rtol=1e-5), "loss mismatch (tiled)"

    print("KERNEL_OK")
</pallas_src>

<mosaic_0001>
module attributes {stable_mosaic.version = 11 : i64} {
  func.func @_fusion_kernel(%arg0: i32, %arg1: memref<8x32xf32, #tpu.memory_space<vmem>>, %arg2: memref<8x32xf32, #tpu.memory_space<vmem>>, %arg3: memref<8x32xf32, #tpu.memory_space<vmem>>, %arg4: memref<32x128xf32, #tpu.memory_space<vmem>>, %arg5: memref<32x128xf32, #tpu.memory_space<vmem>>, %arg6: memref<32x128xf32, #tpu.memory_space<vmem>>, %arg7: memref<1x128xf32, #tpu.memory_space<vmem>>, %arg8: memref<128x128xf32, #tpu.memory_space<vmem>>, %arg9: memref<1x128xf32, #tpu.memory_space<vmem>>, %arg10: memref<1x128xf32, #tpu.memory_space<vmem>>, %arg11: memref<1xf32, #tpu.memory_space<smem>>, %arg12: memref<8x1xf32, #tpu.memory_space<vmem>>) attributes {dimension_semantics = [#tpu.dimension_semantics<parallel>], iteration_bounds = array<i64: 1>, scalar_prefetch = 0 : i64, scratch_operands = 0 : i64, tpu.core_type = #tpu.core_type<tc>, window_params = [{transform_indices = @transform_0, window_bounds = array<i64: 8, 32>}, {transform_indices = @transform_1, window_bounds = array<i64: 8, 32>}, {transform_indices = @transform_2, window_bounds = array<i64: 8, 32>}, {pipeline_mode = #tpu.pipeline_mode<synchronous>, transform_indices = @transform_3, window_bounds = array<i64: 32, 128>}, {pipeline_mode = #tpu.pipeline_mode<synchronous>, transform_indices = @transform_4, window_bounds = array<i64: 32, 128>}, {pipeline_mode = #tpu.pipeline_mode<synchronous>, transform_indices = @transform_5, window_bounds = array<i64: 32, 128>}, {pipeline_mode = #tpu.pipeline_mode<synchronous>, transform_indices = @transform_6, window_bounds = array<i64: 1, 128>}, {pipeline_mode = #tpu.pipeline_mode<synchronous>, transform_indices = @transform_7, window_bounds = array<i64: 128, 128>}, {pipeline_mode = #tpu.pipeline_mode<synchronous>, transform_indices = @transform_8, window_bounds = array<i64: 1, 128>}, {pipeline_mode = #tpu.pipeline_mode<synchronous>, transform_indices = @transform_9, window_bounds = array<i64: 1, 128>}, {transform_indices = @transform_10, window_bounds = array<i64: 1>}, {transform_indices = @transform_11, window_bounds = array<i64: 8, 1>}]} {
    %c0 = arith.constant 0 : index
    %c0_0 = arith.constant 0 : index
    %0 = vector.load %arg1[%c0, %c0_0] : memref<8x32xf32, #tpu.memory_space<vmem>>, vector<8x32xf32>
    %c0_1 = arith.constant 0 : index
    %c0_2 = arith.constant 0 : index
    %1 = vector.load %arg4[%c0_1, %c0_2] : memref<32x128xf32, #tpu.memory_space<vmem>>, vector<32x128xf32>
    %cst = arith.constant dense<0.000000e+00> : vector<8x128xf32>
    %2 = tpu.matmul %0, %1, %cst {dimension_numbers = #tpu.dot_dimension_numbers<[1], [0], [0], [1], [0, 0, 1, 1], [], []>} : vector<8x32xf32>, vector<32x128xf32>, vector<8x128xf32> -> vector<8x128xf32>
    %c0_3 = arith.constant 0 : index
    %c0_4 = arith.constant 0 : index
    %3 = vector.load %arg2[%c0_3, %c0_4] : memref<8x32xf32, #tpu.memory_space<vmem>>, vector<8x32xf32>
    %c0_5 = arith.constant 0 : index
    %c0_6 = arith.constant 0 : index
    %4 = vector.load %arg5[%c0_5, %c0_6] : memref<32x128xf32, #tpu.memory_space<vmem>>, vector<32x128xf32>
    %cst_7 = arith.constant dense<0.000000e+00> : vector<8x128xf32>
    %5 = tpu.matmul %3, %4, %cst_7 {dimension_numbers = #tpu.dot_dimension_numbers<[1], [0], [0], [1], [0, 0, 1, 1], [], []>} : vector<8x32xf32>, vector<32x128xf32>, vector<8x128xf32> -> vector<8x128xf32>
    %6 = arith.addf %2, %5 : vector<8x128xf32>
    %c0_8 = arith.constant 0 : index
    %c0_9 = arith.constant 0 : index
    %7 = vector.load %arg3[%c0_8, %c0_9] : memref<8x32xf32, #tpu.memory_space<vmem>>, vector<8x32xf32>
    %c0_10 = arith.constant 0 : index
    %c0_11 = arith.constant 0 : index
    %8 = vector.load %arg6[%c0_10, %c0_11] : memref<32x128xf32, #tpu.memory_space<vmem>>, vector<32x128xf32>
    %cst_12 = arith.constant dense<0.000000e+00> : vector<8x128xf32>
    %9 = tpu.matmul %7, %8, %cst_12 {dimension_numbers = #tpu.dot_dimension_numbers<[1], [0], [0], [1], [0, 0, 1, 1], [], []>} : vector<8x32xf32>, vector<32x128xf32>, vector<8x128xf32> -> vector<8x128xf32>
    %10 = arith.addf %6, %9 : vector<8x128xf32>
    %c0_13 = arith.constant 0 : index
    %c0_14 = arith.constant 0 : index
    %11 = vector.load %arg7[%c0_13, %c0_14] : memref<1x128xf32, #tpu.memory_space<vmem>>, vector<1x128xf32>
    %12 = vector.broadcast %11 : vector<1x128xf32> to vector<8x128xf32>
    %13 = arith.addf %10, %12 : vector<8x128xf32>
    %cst_15 = arith.constant 0.000000e+00 : f32
    %14 = vector.broadcast %cst_15 : f32 to vector<8x128xf32>
    %15 = arith.maximumf %13, %14 : vector<8x128xf32>
    %c0_16 = arith.constant 0 : index
    %c0_17 = arith.constant 0 : index
    %16 = vector.load %arg8[%c0_16, %c0_17] : memref<128x128xf32, #tpu.memory_space<vmem>>, vector<128x128xf32>
    %cst_18 = arith.constant dense<0.000000e+00> : vector<8x128xf32>
    %17 = tpu.matmul %15, %16, %cst_18 {dimension_numbers = #tpu.dot_dimension_numbers<[1], [0], [0], [1], [0, 0, 1, 1], [], []>} : vector<8x128xf32>, vector<128x128xf32>, vector<8x128xf32> -> vector<8x128xf32>
    %c0_19 = arith.constant 0 : index
    %c0_20 = arith.constant 0 : index
    %18 = vector.load %arg9[%c0_19, %c0_20] : memref<1x128xf32, #tpu.memory_space<vmem>>, vector<1x128xf32>
    %19 = vector.broadcast %18 : vector<1x128xf32> to vector<8x128xf32>
    %20 = arith.addf %17, %19 : vector<8x128xf32>
    %cst_21 = arith.constant 0.000000e+00 : f32
    %21 = vector.broadcast %cst_21 : f32 to vector<8x128xf32>
    %22 = arith.maximumf %20, %21 : vector<8x128xf32>
    %c0_22 = arith.constant 0 : index
    %c0_23 = arith.constant 0 : index
    %23 = vector.load %arg10[%c0_22, %c0_23] : memref<1x128xf32, #tpu.memory_space<vmem>>, vector<1x128xf32>
    %24 = vector.broadcast %23 : vector<1x128xf32> to vector<8x128xf32>
    %25 = arith.mulf %22, %24 : vector<8x128xf32>
    %cst_24 = arith.constant dense<0.000000e+00> : vector<8xf32>
    %26 = vector.multi_reduction <add>, %25, %cst_24 [1] : vector<8x128xf32> to vector<8xf32>
    %27 = vector.shape_cast %26 : vector<8xf32> to vector<8x1xf32>
    %c0_25 = arith.constant 0 : index
    %28 = memref.load %arg11[%c0_25] : memref<1xf32, #tpu.memory_space<smem>>
    %29 = vector.broadcast %28 : f32 to vector<8x1xf32>
    %30 = arith.addf %27, %29 : vector<8x1xf32>
    %c0_26 = arith.constant 0 : index
    %c0_27 = arith.constant 0 : index
    %31 = vector.load %arg12[%c0_26, %c0_27] : memref<8x1xf32, #tpu.memory_space<vmem>>, vector<8x1xf32>
    tpu.vector_store %arg12[%c0_26, %c0_27], %30 {strides = array<i32>} : memref<8x1xf32, #tpu.memory_space<vmem>>, vector<8x1xf32>,
    return
  }
  func.func @transform_0(%arg0: i32) -> (i32, i32) {
    %c0_i32 = arith.constant 0 : i32
    %c0_i32_0 = arith.constant 0 : i32
    return %arg0, %c0_i32 : i32, i32
  }
  func.func @transform_1(%arg0: i32) -> (i32, i32) {
    %c0_i32 = arith.constant 0 : i32
    %c0_i32_0 = arith.constant 0 : i32
    return %arg0, %c0_i32 : i32, i32
  }
  func.func @transform_2(%arg0: i32) -> (i32, i32) {
    %c0_i32 = arith.constant 0 : i32
    %c0_i32_0 = arith.constant 0 : i32
    return %arg0, %c0_i32 : i32, i32
  }
  func.func @transform_3(%arg0: i32) -> (i32, i32) {
    %c0_i32 = arith.constant 0 : i32
    %c0_i32_0 = arith.constant 0 : i32
    %c0_i32_1 = arith.constant 0 : i32
    return %c0_i32, %c0_i32_0 : i32, i32
  }
  func.func @transform_4(%arg0: i32) -> (i32, i32) {
    %c0_i32 = arith.constant 0 : i32
    %c0_i32_0 = arith.constant 0 : i32
    %c0_i32_1 = arith.constant 0 : i32
    return %c0_i32, %c0_i32_0 : i32, i32
  }
  func.func @transform_5(%arg0: i32) -> (i32, i32) {
    %c0_i32 = arith.constant 0 : i32
    %c0_i32_0 = arith.constant 0 : i32
    %c0_i32_1 = arith.constant 0 : i32
    return %c0_i32, %c0_i32_0 : i32, i32
  }
  func.func @transform_6(%arg0: i32) -> (i32, i32) {
    %c0_i32 = arith.constant 0 : i32
    %c0_i32_0 = arith.constant 0 : i32
    %c0_i32_1 = arith.constant 0 : i32
    return %c0_i32, %c0_i32_0 : i32, i32
  }
  func.func @transform_7(%arg0: i32) -> (i32, i32) {
    %c0_i32 = arith.constant 0 : i32
    %c0_i32_0 = arith.constant 0 : i32
    %c0_i32_1 = arith.constant 0 : i32
    return %c0_i32, %c0_i32_0 : i32, i32
  }
  func.func @transform_8(%arg0: i32) -> (i32, i32) {
    %c0_i32 = arith.constant 0 : i32
    %c0_i32_0 = arith.constant 0 : i32
    %c0_i32_1 = arith.constant 0 : i32
    return %c0_i32, %c0_i32_0 : i32, i32
  }
  func.func @transform_9(%arg0: i32) -> (i32, i32) {
    %c0_i32 = arith.constant 0 : i32
    %c0_i32_0 = arith.constant 0 : i32
    %c0_i32_1 = arith.constant 0 : i32
    return %c0_i32, %c0_i32_0 : i32, i32
  }
  func.func @transform_10(%arg0: i32) -> i32 {
    %c0_i32 = arith.constant 0 : i32
    %c0_i32_0 = arith.constant 0 : i32
    return %c0_i32 : i32
  }
  func.func @transform_11(%arg0: i32) -> (i32, i32) {
    %c0_i32 = arith.constant 0 : i32
    %c0_i32_0 = arith.constant 0 : i32
    return %arg0, %c0_i32 : i32, i32
  }
}

</mosaic_0001>

<bundles_post_ra>
// kernel: tpu_custom_call.1
= control target key start
LH: loop header
LB: loop body
LE: loop exit
PB: predicated region body
PF: predicated region fallthrough
CT: control target
= control target key end

     0   :  { %17 = vsyncpa [#allocation4], 0  ;;  %s972_s0 = inlined_call_operand.hbm [shape: f32[8,32], index: 0, kind: input, shape index: {}]   ;;  %s973_s1 = inlined_call_operand.hbm [shape: f32[8,32], index: 1, kind: input, shape index: {}]   ;;  %s974_s2 = inlined_call_operand.vmem [shape: f32[8,32], index: 2, kind: input, shape index: {}]   ;;  %s975_s3 = inlined_call_operand.hbm [shape: f32[32,128], index: 3, kind: input, shape index: {}]   ;;  %s976_s4 = inlined_call_operand.hbm [shape: f32[32,128], index: 4, kind: input, shape index: {}]   ;;  %s977_s5 = inlined_call_operand.hbm [shape: f32[32,128], index: 5, kind: input, shape index: {}]   ;;  %s978_s6 = inlined_call_operand.vmem [shape: f32[1,128], index: 6, kind: input, shape index: {}]   ;;  %s979_s7 = inlined_call_operand.hbm [shape: f32[128,128], index: 7, kind: input, shape index: {}]   ;;  %s980_s8 = inlined_call_operand.vmem [shape: f32[1,128], index: 8, kind: input, shape index: {}]   ;;  %s981_s9 = inlined_call_operand.vmem [shape: f32[1,128], index: 9, kind: input, shape index: {}]   ;;  %s982_s10 = inlined_call_operand.<no memory space> [shape: f32[1], index: 10, kind: input, shape index: {}]   ;;  %s983_s11 = inlined_call_operand.vmem [shape: f32[8,1], index: 11, kind: output, shape index: {}]  }
   0x1   :  { %18 = vsyncpa [#allocation6], 0 }
   0x2   :  { %19 = vsyncpa [#allocation9], 0 }
   0x3   :  { %20 = vsyncpa [#allocation12], 0  ;;  %s778_s17 = smov [#allocation5]   ;;  %s638_s21 = scalar_lea.hbm %s973_s1, 128 }
   0x4   :  { %s37_s18 = sshll.u32 %s778_s17, 4  ;;  %p639_p0 = scmp.ne.s32.totalorder %s973_s1, %s638_s21  ;;  %s38_s18 = int_to_ptr.vmem [resolvable:$true] %s37_s18 }
   0x5   :  { %p642_p1 = scmp.lt.u32.totalorder %s638_s21, %s973_s1 }
   0x7   :  { %p644_p2 = pnand %p642_p1, %p639_p0 }
   0x9   :  { %647 = shalt.err (!%p644_p2)
}
   0xa   :  { %s648_s26 = scalar_lea.vmem %s38_s18, 128  ;;  %p653_p4 = scmp.lt.s32.totalorder %s38_s18, %s38_s18 }
   0xb   :  { %p649_p3 = scmp.ne.s32.totalorder %s38_s18, %s648_s26  ;;  %p654_p5 = scmp.lt.s32.totalorder %s648_s26, %s648_s26 }
   0xd   :  { %p655_p6 = por %p654_p5, %p653_p4 }
   0xf   :  { %p656_p7 = pnand %p655_p6, %p649_p3 }
  0x11   :  { %659 = shalt.err (!%p656_p7)
}
  0x12   :  { %40 = dma.hbm_to_vmem [thread:$0]  %s973_s1, 128, %s38_s18, [#allocation6]  }
  0x13   :  { %s779_s29 = smov [#allocation8]   ;;  %s780_s12 = smov [#allocation3]  }
  0x14   :  { %s60_s30 = sshll.u32 %s779_s29, 4  ;;  %s27_s13 = sshll.u32 %s780_s12, 4  ;;  %s61_s30 = int_to_ptr.vmem [resolvable:$true] %s60_s30  ;;  %s28_s13 = int_to_ptr.vmem [resolvable:$true] %s27_s13 }
  0x15   :  { %s660_s16 = scalar_lea.hbm %s976_s4, 512 }
  0x16   :  { %p661_p8 = scmp.ne.s32.totalorder %s976_s4, %s660_s16  ;;  %p664_p9 = scmp.lt.u32.totalorder %s660_s16, %s976_s4 }
  0x18   :  { %p666_p10 = pnand %p664_p9, %p661_p8 }
  0x1a   :  { %669 = shalt.err (!%p666_p10)
}
  0x1b   :  { %s670_s1 = scalar_lea.vmem %s61_s30, 512  ;;  %p675_p12 = scmp.lt.s32.totalorder %s61_s30, %s61_s30 }
  0x1c   :  { %p671_p11 = scmp.ne.s32.totalorder %s61_s30, %s670_s1  ;;  %p676_p13 = scmp.lt.s32.totalorder %s670_s1, %s670_s1 }
  0x1e   :  { %p677_p0 = por %p676_p13, %p675_p12 }
  0x20   :  { %p678_p1 = pnand %p677_p0, %p671_p11 }
  0x22   :  { %681 = shalt.err (!%p678_p1)
}
  0x23   :  { %s781_s18 = smov 128   ;;  %s782_s22 = smov 8  }
  0x24   :  { %66 = dma.hbm_to_vmem [thread:$0]  %s976_s4, 512, %s61_s30, [#allocation9], %s781_s18, %s781_s18, %s782_s22  }
  0x25   :  { %s682_s27 = scalar_lea.hbm %s972_s0, 128 }
  0x26   :  { %p683_p2 = scmp.ne.s32.totalorder %s972_s0, %s682_s27  ;;  %p686_p3 = scmp.lt.u32.totalorder %s682_s27, %s972_s0 }
  0x28   :  { %p688_p4 = pnand %p686_p3, %p683_p2 }
  0x2a   :  { %691 = shalt.err (!%p688_p4)
}
  0x2b   :  { %s692_s15 = scalar_lea.vmem %s28_s13, 128  ;;  %p697_p6 = scmp.lt.s32.totalorder %s28_s13, %s28_s13 }
  0x2c   :  { %p693_p5 = scmp.ne.s32.totalorder %s28_s13, %s692_s15  ;;  %p698_p7 = scmp.lt.s32.totalorder %s692_s15, %s692_s15 }
  0x2e   :  { %p699_p8 = por %p698_p7, %p697_p6 }
  0x30   :  { %p700_p9 = pnand %p699_p8, %p693_p5 }
  0x32   :  { %703 = shalt.err (!%p700_p9)
}
  0x33   :  { %30 = dma.hbm_to_vmem [thread:$0]  %s972_s0, 128, %s28_s13, [#allocation4]  }
  0x34   :  { %s783_s16 = smov [#allocation7]   ;;  %s784_s19 = smov [#allocation10]  }
  0x35   :  { %s48_s17 = sshll.u32 %s783_s16, 4  ;;  %s72_s20 = sshll.u32 %s784_s19, 4  ;;  %s49_s17 = int_to_ptr.vmem [resolvable:$true] %s48_s17  ;;  %s73_s20 = int_to_ptr.vmem [resolvable:$true] %s72_s20 }
  0x36   :  { %s704_s23 = scalar_lea.hbm %s975_s3, 512 }
  0x37   :  { %p705_p10 = scmp.ne.s32.totalorder %s975_s3, %s704_s23  ;;  %p708_p11 = scmp.lt.u32.totalorder %s704_s23, %s975_s3 }
  0x39   :  { %p710_p12 = pnand %p708_p11, %p705_p10 }
  0x3b   :  { %713 = shalt.err (!%p710_p12)
}
  0x3c   :  { %s714_s0 = scalar_lea.vmem %s49_s17, 512  ;;  %p719_p0 = scmp.lt.s32.totalorder %s49_s17, %s49_s17 }
  0x3d   :  { %p715_p13 = scmp.ne.s32.totalorder %s49_s17, %s714_s0  ;;  %p720_p1 = scmp.lt.s32.totalorder %s714_s0, %s714_s0 }
  0x3f   :  { %p721_p2 = por %p720_p1, %p719_p0 }
  0x41   :  { %p722_p3 = pnand %p721_p2, %p715_p13 }
  0x43   :  { %725 = shalt.err (!%p722_p3)
}
  0x44   :  { %54 = dma.hbm_to_vmem [thread:$0]  %s975_s3, 512, %s49_s17, [#allocation6], %s781_s18, %s781_s18, %s782_s22  }
  0x45   :  { %s726_s14 = scalar_lea.hbm %s977_s5, 512 }
  0x46   :  { %p727_p4 = scmp.ne.s32.totalorder %s977_s5, %s726_s14  ;;  %p730_p5 = scmp.lt.u32.totalorder %s726_s14, %s977_s5 }
  0x48   :  { %p732_p6 = pnand %p730_p5, %p727_p4 }
  0x4a   :  { %735 = shalt.err (!%p732_p6)
}
  0x4b   :  { %s736_s19 = scalar_lea.vmem %s73_s20, 512  ;;  %p741_p8 = scmp.lt.s32.totalorder %s73_s20, %s73_s20 }
  0x4c   :  { %p737_p7 = scmp.ne.s32.totalorder %s73_s20, %s736_s19  ;;  %p742_p9 = scmp.lt.s32.totalorder %s736_s19, %s736_s19 }
  0x4e   :  { %p743_p10 = por %p742_p9, %p741_p8 }
  0x50   :  { %p744_p11 = pnand %p743_p10, %p737_p7 }
  0x52   :  { %747 = shalt.err (!%p744_p11)
}
  0x53   :  { %78 = dma.hbm_to_vmem [thread:$0]  %s977_s5, 512, %s73_s20, [#allocation9], %s781_s18, %s781_s18, %s782_s22  }
  0x54   :  { %s785_s21 = smov [#allocation11]   ;;  %s748_s25 = scalar_lea.hbm %s979_s7, 2048 }
  0x55   :  { %s86_s1 = sshll.u32 %s785_s21, 4  ;;  %p749_p12 = scmp.ne.s32.totalorder %s979_s7, %s748_s25  ;;  %s87_s1 = int_to_ptr.vmem [resolvable:$true] %s86_s1 }
  0x56   :  { %p752_p13 = scmp.lt.u32.totalorder %s748_s25, %s979_s7 }
  0x58   :  { %p754_p0 = pnand %p752_p13, %p749_p12 }
  0x5a   :  { %757 = shalt.err (!%p754_p0)
}
  0x5b   :  { %s758_s28 = scalar_lea.vmem %s87_s1, 2048  ;;  %p763_p2 = scmp.lt.s32.totalorder %s87_s1, %s87_s1 }
  0x5c   :  { %p759_p1 = scmp.ne.s32.totalorder %s87_s1, %s758_s28  ;;  %p764_p3 = scmp.lt.s32.totalorder %s758_s28, %s758_s28 }
  0x5e   :  { %p765_p4 = por %p764_p3, %p763_p2 }
  0x60   :  { %p766_p5 = pnand %p765_p4, %p759_p1 }
  0x62   :  { %769 = shalt.err (!%p766_p5)
}
  0x63   :  { %92 = dma.hbm_to_vmem [thread:$0]  %s979_s7, 2048, %s87_s1, [#allocation12], %s781_s18, %s781_s18, %s782_s22  }
  0x64   :  { %770 = dma.done.wait [#allocation4], 128  }
  0x65   :  { %771 = vsyncadd [#allocation4], 4294967168 }
  0x66   :  { %772 = dma.done.wait [#allocation6], 640  }
  0x67   :  { %773 = vsyncadd [#allocation6], 4294966656 }
  0x68   :  { %774 = dma.done.wait [#allocation9], 1024  }
  0x69   :  { %775 = vsyncadd [#allocation9], 4294966272 }
  0x6a   :  { %776 = dma.done.wait [#allocation12], 2048  }
  0x6b   :  { %777 = vsyncadd [#allocation12], 4294965248  ;;  %v786_v0 = vmov 0.0|0.0   ;;  %vm787_vm0 = vmmov 0   ;;  %v788_v1 = vmov 0.0   ;;  %v123_v2 = vld [vmem:[#allocation8] sm:$0xff] }
  0x6c   :  { %585 = vmatprep.subr.bf16.mxu0 %v786_v0  ;;  %525 = vmatprep.mubr.msk.f32.mxu0 %vm787_vm0, %v788_v1  ;;  %v124_v3 = vld [vmem:[#allocation8 + $0x8] sm:$0xff]  ;;  %v125_v4 = vld [vmem:[#allocation8 + $0x10] sm:$0xff]  ;;  %v126_v6 = vld [vmem:[#allocation8 + $0x18] sm:$0xff]  ;;  %vm127_vm1 = vcmask 261120   ;;  %vm469_vm2 = vcmask 7168  }
  0x6d   :  { %603 = vmatprep.subr.bf16.mxu1 %v786_v0  ;;  %582 = vmatprep.mubr.msk.f32.mxu1 %vm787_vm0, %v788_v1  ;;  %v586_v5 = vpack.c.bf16 %v124_v3, %v123_v2  ;;  %v589_v7 = vpack.c.bf16 %v126_v6, %v125_v4  ;;  %v118_v8 = vld [vmem:[#allocation7] sm:$0xff]  ;;  %v119_v9 = vld [vmem:[#allocation7 + $0x8] sm:$0xff]  ;;  %v364_v12 = vld [vmem:[#allocation11 + $0x10] sm:$0xff] }
  0x6e   :  { %v362_v10 = vld [vmem:[#allocation11] sm:$0xff]  ;;  %v363_v11 = vld [vmem:[#allocation11 + $0x8] sm:$0xff]  ;;  %v365_v14 = vld [vmem:[#allocation11 + $0x18] sm:$0xff]  ;;  %v592_v16 = vpack.c.bf16 %v119_v9, %v118_v8 }
  0x6f   :  { %587 = vmatpush3.bf16.msra.mxu0 %v586_v5  ;;  %v604_v13 = vpack.c.bf16 %v363_v11, %v362_v10  ;;  %v122_v15 = vld [vmem:[#allocation5] sm:$0xff]  ;;  %v120_v17 = vld [vmem:[#allocation7 + $0x10] sm:$0xff]  ;;  %v607_v19 = vpack.c.bf16 %v365_v14, %v364_v12  ;;  %v275_v21 = vld [vmem:[#allocation10] sm:$0xff] }
  0x70   :  { %588 = vmatprep.subr.bf16.mxu0 %v786_v0  ;;  %v121_v18 = vld [vmem:[#allocation7 + $0x18] sm:$0xff]  ;;  %v276_v22 = vld [vmem:[#allocation10 + $0x8] sm:$0xff]  ;;  %v117_v23 = vld [vmem:[#allocation3] sm:$0xff] }
  0x71   :  { %605 = vmatpush3.bf16.msra.mxu1 %v604_v13  ;;  %v595_v20 = vpack.c.bf16 %v121_v18, %v120_v17  ;;  %v598_v24 = vpack.c.bf16 %v276_v22, %v275_v21  ;;  %v277_v25 = vld [vmem:[#allocation10 + $0x10] sm:$0xff]  ;;  %v278_v26 = vld [vmem:[#allocation10 + $0x18] sm:$0xff]  ;;  %v366_v29 = vld [vmem:[#allocation11 + $0x20] sm:$0xff] }
  0x72   :  { %606 = vmatprep.subr.bf16.mxu1 %v786_v0  ;;  %v601_v27 = vpack.c.bf16 %v278_v26, %v277_v25  ;;  %v274_v28 = vld [vmem:[%s974_s2] sm:$0xff]  ;;  %v367_v30 = vld [vmem:[#allocation11 + $0x28] sm:$0xff]  ;;  %v369_v33 = vld [vmem:[#allocation11 + $0x38] sm:$0xff] }
  0x73   :  { %590 = vmatpush3.bf16.msra.mxu0 %v589_v7  ;;  %v610_v31 = vpack.c.bf16 %v367_v30, %v366_v29  ;;  %v368_v32 = vld [vmem:[#allocation11 + $0x30] sm:$0xff]  ;;  %v370_v35 = vld [vmem:[#allocation11 + $0x40] sm:$0xff]  ;;  %v371_v36 = vld [vmem:[#allocation11 + $0x48] sm:$0xff] }
  0x74   :  { %591 = vmatprep.subr.bf16.mxu0 %v786_v0  ;;  %v613_v34 = vpack.c.bf16 %v369_v33, %v368_v32  ;;  %v616_v37 = vpack.c.bf16 %v371_v36, %v370_v35  ;;  %v372_v38 = vld [vmem:[#allocation11 + $0x50] sm:$0xff]  ;;  %v373_v39 = vld [vmem:[#allocation11 + $0x58] sm:$0xff]  ;;  %v374_v41 = vld [vmem:[#allocation11 + $0x60] sm:$0xff] }
  0x75   :  { %608 = vmatpush3.bf16.msra.mxu1 %v607_v19  ;;  %v619_v40 = vpack.c.bf16 %v373_v39, %v372_v38  ;;  %v375_v42 = vld [vmem:[#allocation11 + $0x68] sm:$0xff]  ;;  %v376_v44 = vld [vmem:[#allocation11 + $0x70] sm:$0xff]  ;;  %v377_v45 = vld [vmem:[#allocation11 + $0x78] sm:$0xff] }
  0x76   :  { %526 = vmatmul.mubr.msk.f32.vlgmr.msra.gmra.mrb[0].mxu0 %vm127_vm1, %v122_v15  ;;  %609 = vmatprep.subr.bf16.mxu1 %v786_v0  ;;  %v622_v43 = vpack.c.bf16 %v375_v42, %v374_v41  ;;  %v625_v46 = vpack.c.bf16 %v377_v45, %v376_v44  ;;  %v482_v53 = vld [vmem:[%s978_s6] ss:$0 sm:$0xff] }
  0x77   :  { %593 = vmatpush3.bf16.msra.mxu0 %v592_v16  ;;  %536 = vmatprep.mubr.msk.f32.mxu0 %vm787_vm0, %v788_v1  ;;  %v483_v58 = vld [vmem:[%s980_s8] ss:$0 sm:$0xff] }
  0x78   :  { %594 = vmatprep.subr.bf16.mxu0 %v786_v0  ;;  %v484_v62 = vld [vmem:[%s981_s9] ss:$0 sm:$0xff] }
  0x79   :  { %611 = vmatpush3.bf16.msra.mxu1 %v610_v31 }
  0x7a   :  { %612 = vmatprep.subr.bf16.mxu1 %v786_v0 }
  0x7b   :  { %596 = vmatpush3.bf16.msra.mxu0 %v595_v20 }
  0x7c   :  { %597 = vmatprep.subr.bf16.mxu0 %v786_v0 }
  0x7d   :  { %614 = vmatpush3.bf16.msra.mxu1 %v613_v34 }
  0x7e   :  { %537 = vmatmul.mubr.msk.f32.vlgmr.msra.gmra.mrb[2].mxu0 %vm127_vm1, %v117_v23  ;;  %615 = vmatprep.subr.bf16.mxu1 %v786_v0 }
  0x7f   :  { %599 = vmatpush3.bf16.msra.mxu0 %v598_v24  ;;  %547 = vmatprep.mubr.msk.f32.mxu0 %vm787_vm0, %v788_v1  ;;  %v467_v1 = vstv %s982_s10 }
  0x80   :  { %600 = vmatprep.subr.bf16.mxu0 %v786_v0 }
  0x81   :  { %617 = vmatpush3.bf16.msra.mxu1 %v616_v37 }
  0x82   :  { %618 = vmatprep.subr.bf16.mxu1 %v786_v0 }
  0x83   :  { %602 = vmatpush3.bf16.msra.mxu0 %v601_v27 }
  0x85   :  { %620 = vmatpush3.bf16.msra.mxu1 %v619_v40 }
  0x86   :  { %548 = vmatmul.mubr.msk.f32.vlgmr.msra.gmra.mrb[4].mxu0 %vm127_vm1, %v274_v28  ;;  %621 = vmatprep.subr.bf16.mxu1 %v786_v0 }
  0x89   :  { %623 = vmatpush3.bf16.msra.mxu1 %v622_v43 }
  0x8a   :  { %624 = vmatprep.subr.bf16.mxu1 %v786_v0 }
  0x8d   :  { %626 = vmatpush3.bf16.msra.mxu1 %v625_v46 }
 0x149   :  { %v197_v47 = vpop.f32.mrb[0].mxu0 }
 0x14a   :  { %v527_v48 = vpop.f32.mrb[1].mxu0 }
 0x151   :  { %v270_v49 = vpop.f32.mrb[2].mxu0 }
 0x152   :  { %v271_v50 = vadd.f32 %v270_v49, %v197_v47  ;;  %v538_v51 = vpop.f32.mrb[3].mxu0 }
 0x159   :  { %v348_v52 = vpop.f32.mrb[4].mxu0 }
 0x15a   :  { %v352_v54 = vadd.f32 %v348_v52, %v271_v50  ;;  %v549_v55 = vpop.f32.mrb[5].mxu0 }
 0x15c   :  { %v360_v56 = vadd.f32 %v482_v53, %v352_v54 }
 0x15e   :  { %v361_v57 = vmax.f32 %v360_v56, 0.0 }
 0x160   :  { %583 = vmatmul.mubr.f32.vlgmr.msra.gmra.mrb[0].mxu1 %v361_v57 }
 0x233   :  { %v451_v59 = vpop.f32.mrb[0].mxu1 }
 0x234   :  { %v452_v60 = vadd.f32 %v483_v58, %v451_v59  ;;  %v584_v61 = vpop.f32.mrb[1].mxu1 }
 0x236   :  { %v455_v63 = vmax.f32 %v452_v60, 0.0 }
 0x238   :  { %v463_v0 = vmul.f32 %v484_v62, %v455_v63 }
 0x23a   :  { %464 = vadd.xlane.f32.xlu0 %v463_v0 }
 0x2c7   :  { %v465_v2 = vpop.xlane.xlu0 %464 }
 0x2c8   :  { %v468_v3 = vadd.f32 %v467_v1, %v465_v2 }
 0x2ca   :  { %470 = vst.msk [vmem:[%s983_s11] sm:$0xff] %vm469_vm2, %v468_v3 }
 0x2cb   :  { %475 = vsyncpa [#allocation4], 1 }
 0x2cc   :  { %476 = vsyncpa [#allocation6], 1 }
 0x2cd   :  { %477 = vsyncpa [#allocation9], 1 }
 0x2ce   :  { %478 = vsyncpa [#allocation12], 1 }

</bundles_post_ra>
